<compile_context>
chip_gen: v7x
topology: tpu7x:2x2x1
jax: 0.10.0
libtpu: 0.0.40
codegen_flags: <defaults>
</compile_context>

<pallas_src>
import functools
import math

import jax
import jax.numpy as jnp
from jax.experimental import pallas as pl
from jax.experimental.pallas import tpu as pltpu

LANE = 128  # lane width


def _round_up(a, b):
    return ((a + b - 1) // b) * b


def _sublane_multiple(dtype):
    itemsize = jnp.dtype(dtype).itemsize
    return max(8, 32 // max(itemsize, 1))   # f32->8, bf16->16, int8/fp8->32


def _chip_config():
    """Per-generation grid / block configuration."""
    try:
        kind = jax.devices()[0].device_kind.lower()
    except Exception:
        kind = ""
    if "v7" in kind or "7x" in kind:
        # v7x: 2 TensorCores per chip share ~3.2 TB/s HBM -> split blocks
        # across both cores and use bigger blocks (VMEM is 64 MiB there).
        return dict(num_cores=2, max_block_rows=2048, core_parallel=True,
                    vmem_limit_bytes=48 * 1024 * 1024)
    # v5e / v6e: single TensorCore, default scoped VMEM is plenty.
    return dict(num_cores=1, max_block_rows=1024, core_parallel=False,
                vmem_limit_bytes=None)


def _dice_bce_kernel(x_ref, t_ref, acc_ref, *, block_rows, rows_total,
                     blocks_per_core, binary_targets, any_masking):
    """Accumulates per-core (32,128) partial sums.

    acc_ref rows 0:8 -> sum(x*t), 8:16 -> sum(x), 16:24 -> sum(t),
    24:32 -> sum(elementwise BCE).
    """
    c = pl.program_id(0)   # core / leading axis
    i = pl.program_id(1)   # block index within this core's range

    @pl.when(i == 0)
    def _init():
        acc_ref[...] = jnp.zeros_like(acc_ref)

    def accumulate(masked):
        x = x_ref[...].astype(jnp.float32)
        t = t_ref[...].astype(jnp.float32)

        if masked:
            # Zero rows past the end of the array (tail block) and fully zero
            # phantom blocks created by the core split (clamped index_map).
            block_idx = c * blocks_per_core + i        # intended (unclamped)
            row0 = block_idx * block_rows
            row_ids = jax.lax.broadcasted_iota(jnp.int32, x.shape, 0) + row0
            valid = row_ids < rows_total
            zero = jnp.float32(0.0)
            x = jnp.where(valid, x, zero)              # select is NaN-safe
            t = jnp.where(valid, t, zero)

        if binary_targets:
            # Single-log form: exact when t is strictly {0, 1}.
            p_true = jnp.where(t > 0.5, x, 1.0 - x)
            bce = -jnp.maximum(jnp.log(p_true), jnp.float32(-100.0))
        else:
            # General (soft-target) BCE with PyTorch's log clamp at -100.
            log_x = jnp.maximum(jnp.log(x), jnp.float32(-100.0))
            log_1mx = jnp.maximum(jnp.log(1.0 - x), jnp.float32(-100.0))
            bce = -(t * log_x + (1.0 - t) * log_1mx)

        def fold(a):
            # (block_rows, LANE) -> (8, LANE): pure VPU adds across vregs,
            # no cross-lane (XLU) reduction in the hot loop.
            return jnp.sum(a.reshape(block_rows // 8, 8, LANE), axis=0)

        # Single (32,128) read-modify-write instead of four 8-row RMWs.
        acc_ref[...] += jnp.concatenate(
            [fold(x * t), fold(x), fold(t), fold(bce)], axis=0)

    if any_masking:
        row_end = (c * blocks_per_core + i + 1) * block_rows

        @pl.when(row_end <= rows_total)
        def _full_block():
            accumulate(masked=False)      # hot path: no mask work at all

        @pl.when(row_end > rows_total)
        def _tail_block():
            accumulate(masked=True)       # only the tail / phantom block
    else:
        accumulate(masked=False)


@functools.partial(jax.jit,
                   static_argnames=("assume_binary_targets", "max_block_rows"))
def dice_bce_loss(inputs, targets, assume_binary_targets=False,
                  max_block_rows=None):
    """Equivalent of DiceBCELoss.forward(inputs, targets).

    `inputs` are probabilities in [0, 1]; `targets` are BCE targets.
    assume_binary_targets=True is exact only for targets strictly in {0, 1}
    (cheaper single-log BCE); the default matches PyTorch nn.BCELoss for
    soft targets as well.
    """
    n = math.prod(inputs.shape)
    x = inputs.reshape(-1)               # native dtype, no astype copy
    t = targets.reshape(-1)

    cfg = _chip_config()
    num_cores = cfg["num_cores"]
    if max_block_rows is None:
        max_block_rows = cfg["max_block_rows"]

    rows = n // LANE                     # full 128-wide rows
    n_main = rows * LANE

    inter = jnp.float32(0.0)
    sum_x = jnp.float32(0.0)
    sum_t = jnp.float32(0.0)
    bce_sum = jnp.float32(0.0)

    if rows > 0:
        x2d = (x if n_main == n else x[:n_main]).reshape(rows, LANE)
        t2d = (t if n_main == n else t[:n_main]).reshape(rows, LANE)

        # Round the block to both operands' native sublane multiple.
        sub = max(_sublane_multiple(x2d.dtype), _sublane_multiple(t2d.dtype))
        block_rows = _round_up(min(max_block_rows, _round_up(rows, sub)), sub)
        nb = pl.cdiv(rows, block_rows)           # total row-blocks
        bpc = pl.cdiv(nb, num_cores)             # blocks per core
        # Masking needed only if the grid over-covers the row range.
        any_masking = (num_cores * bpc * block_rows) != rows

        if num_cores * bpc > nb:
            # Odd block count across cores: clamp phantom block's load to a
            # valid block; its contribution is fully masked to zero.
            def in_index(c, i):
                return (jnp.minimum(c * bpc + i, nb - 1), 0)
        else:
            def in_index(c, i):
                return (c * bpc + i, 0)

        kernel = functools.partial(
            _dice_bce_kernel,
            block_rows=block_rows,
            rows_total=rows,
            blocks_per_core=bpc,
            binary_targets=assume_binary_targets,
            any_masking=any_masking,
        )

        if cfg["core_parallel"]:
            dim_sem = (pltpu.CORE_PARALLEL, pltpu.ARBITRARY)
        else:
            dim_sem = ("arbitrary", "arbitrary")

        cost = pl.CostEstimate(
            flops=12 * n_main,
            transcendentals=(1 if assume_binary_targets else 2) * n_main,
            bytes_accessed=(x2d.size * x2d.dtype.itemsize
                            + t2d.size * t2d.dtype.itemsize
                            + num_cores * 32 * LANE * 4),
        )

        acc = pl.pallas_call(
            kernel,
            out_shape=jax.ShapeDtypeStruct((num_cores, 32, LANE), jnp.float32),
            grid_spec=pltpu.PrefetchScalarGridSpec(
                num_scalar_prefetch=0,
                grid=(num_cores, bpc),
                in_specs=[
                    pl.BlockSpec((block_rows, LANE), in_index),
                    pl.BlockSpec((block_rows, LANE), in_index),
                ],
                out_specs=pl.BlockSpec((None, 32, LANE), lambda c, i: (c, 0, 0)),
            ),
            compiler_params=pltpu.CompilerParams(
                dimension_semantics=dim_sem,
                vmem_limit_bytes=cfg["vmem_limit_bytes"]),
            cost_estimate=cost,
        )(x2d, t2d)

        inter = jnp.sum(acc[:, 0:8, :])
        sum_x = jnp.sum(acc[:, 8:16, :])
        sum_t = jnp.sum(acc[:, 16:24, :])
        bce_sum = jnp.sum(acc[:, 24:32, :])

    if n_main < n:
        # <128-element lane tail: reduce in plain JAX (no full-array pad copy).
        xt = x[n_main:].astype(jnp.float32)
        tt = t[n_main:].astype(jnp.float32)
        inter = inter + jnp.sum(xt * tt)
        sum_x = sum_x + jnp.sum(xt)
        sum_t = sum_t + jnp.sum(tt)
        log_x = jnp.maximum(jnp.log(xt), jnp.float32(-100.0))
        log_1mx = jnp.maximum(jnp.log(1.0 - xt), jnp.float32(-100.0))
        bce_sum = bce_sum + jnp.sum(-(tt * log_x + (1.0 - tt) * log_1mx))

    dice = (2.0 * inter + 1.0) / (sum_x + sum_t + 1.0)
    bce = bce_sum / jnp.float32(n)       # nn.BCELoss default reduction='mean'
    return 1.0 - dice + bce


def _ref_loss(inputs, targets):
    xf = inputs.reshape(-1).astype(jnp.float32)
    tf = targets.reshape(-1).astype(jnp.float32)
    inter = jnp.sum(xf * tf)
    dice = (2.0 * inter + 1.0) / (jnp.sum(xf) + jnp.sum(tf) + 1.0)
    bce = jnp.mean(-(tf * jnp.maximum(jnp.log(xf), -100.0)
                     + (1.0 - tf) * jnp.maximum(jnp.log(1.0 - xf), -100.0)))
    return 1.0 - dice + bce


if __name__ == "__main__":
    key = jax.random.PRNGKey(0)
    k1, k2, k3, k4, k5, k6, k7, k8 = jax.random.split(key, 8)

    # Test A: segmentation-head shape, aligned, single (padded) block; both
    # BCE paths.
    shape_a = (2, 1, 16, 16)
    in_a = jax.random.uniform(k1, shape_a, dtype=jnp.float32,
                              minval=1e-4, maxval=1.0 - 1e-4)
    tg_a = (jax.random.uniform(k2, shape_a) > 0.5).astype(jnp.float32)
    loss_a_gen = dice_bce_loss(in_a, tg_a, assume_binary_targets=False)
    loss_a_bin = dice_bce_loss(in_a, tg_a, assume_binary_targets=True)

    # Test B: multi-block with a ragged tail block (masked path + fast path),
    # small max_block_rows just to exercise the split.
    shape_b = (2, 4, 16, 20)   # 2560 elems -> 20 rows of 128; 3 blocks of 8
    in_b = jax.random.uniform(k3, shape_b, dtype=jnp.float32,
                              minval=1e-4, maxval=1.0 - 1e-4)
    tg_b = (jax.random.uniform(k4, shape_b) > 0.5).astype(jnp.float32)
    loss_b = dice_bce_loss(in_b, tg_b, assume_binary_targets=True,
                           max_block_rows=8)

    # Test C: element count not a multiple of 128 -> JAX lane-tail path.
    shape_c = (2, 3, 17, 19)   # 1938 elems -> 15 rows + 18-element tail
    in_c = jax.random.uniform(k5, shape_c, dtype=jnp.float32,
                              minval=1e-4, maxval=1.0 - 1e-4)
    tg_c = (jax.random.uniform(k6, shape_c) > 0.5).astype(jnp.float32)
    loss_c = dice_bce_loss(in_c, tg_c, assume_binary_targets=False,
                           max_block_rows=8)

    # Test D: bf16 inputs streamed natively (sublane multiple 16).
    shape_d = (2, 4, 16, 16)   # 2048 elems -> 16 rows
    in_d = jax.random.uniform(k7, shape_d, dtype=jnp.float32,
                              minval=0.01, maxval=0.99).astype(jnp.bfloat16)
    tg_d = (jax.random.uniform(k8, shape_d) > 0.5).astype(jnp.float32)
    loss_d = dice_bce_loss(in_d, tg_d, assume_binary_targets=False)

    jax.block_until_ready((loss_a_gen, loss_a_bin, loss_b, loss_c, loss_d))

    assert jnp.allclose(loss_a_gen, _ref_loss(in_a, tg_a), rtol=1e-5, atol=1e-5)
    assert jnp.allclose(loss_a_bin, _ref_loss(in_a, tg_a), rtol=1e-5, atol=1e-5)
    assert jnp.allclose(loss_b, _ref_loss(in_b, tg_b), rtol=1e-5, atol=1e-5)
    assert jnp.allclose(loss_c, _ref_loss(in_c, tg_c), rtol=1e-5, atol=1e-5)
    assert jnp.allclose(loss_d, _ref_loss(in_d, tg_d), rtol=1e-5, atol=1e-5)

    print("KERNEL_OK")
</pallas_src>

<mosaic_0001>
module attributes {stable_mosaic.version = 11 : i64} {
  func.func @_dice_bce_kernel(%arg0: i32, %arg1: i32, %arg2: memref<8x128xf32, #tpu.memory_space<vmem>>, %arg3: memref<8x128xf32, #tpu.memory_space<vmem>>, %arg4: memref<1x32x128xf32, #tpu.memory_space<vmem>>) attributes {dimension_semantics = [#tpu.dimension_semantics<arbitrary>, #tpu.dimension_semantics<arbitrary>], iteration_bounds = array<i64: 1, 1>, scalar_prefetch = 0 : i64, scratch_operands = 0 : i64, tpu.core_type = #tpu.core_type<tc>, window_params = [{transform_indices = @transform_0, window_bounds = array<i64: 8, 128>}, {transform_indices = @transform_1, window_bounds = array<i64: 8, 128>}, {transform_indices = @transform_2, window_bounds = array<i64: 1, 32, 128>}]} {
    %c0_i32 = arith.constant 0 : i32
    %0 = arith.cmpi eq, %arg1, %c0_i32 : i32
    %1 = arith.extui %0 : i1 to i32
    %c0_i32_0 = arith.constant 0 : i32
    %2 = arith.cmpi ne, %1, %c0_i32_0 : i32
    scf.if %2 {
      %cst = arith.constant 0.000000e+00 : f32
      %13 = vector.broadcast %cst : f32 to vector<32x128xf32>
      %c0 = arith.constant 0 : index
      %c0_5 = arith.constant 0 : index
      %c0_6 = arith.constant 0 : index
      %14 = vector.load %arg4[%c0, %c0_5, %c0_6] : memref<1x32x128xf32, #tpu.memory_space<vmem>>, vector<1x32x128xf32>
      %15 = vector.shape_cast %14 : vector<1x32x128xf32> to vector<32x128xf32>
      %16 = vector.shape_cast %13 : vector<32x128xf32> to vector<1x32x128xf32>
      tpu.vector_store %arg4[%c0, %c0_5, %c0_6], %16 {strides = array<i32>} : memref<1x32x128xf32, #tpu.memory_space<vmem>>, vector<1x32x128xf32>,
    } else {
    }
    %c1_i32 = arith.constant 1 : i32
    %3 = arith.muli %arg0, %c1_i32 : i32
    %4 = arith.addi %3, %arg1 : i32
    %c1_i32_1 = arith.constant 1 : i32
    %5 = arith.addi %4, %c1_i32_1 : i32
    %c8_i32 = arith.constant 8 : i32
    %6 = arith.muli %5, %c8_i32 : i32
    %c4_i32 = arith.constant 4 : i32
    %7 = arith.cmpi sle, %6, %c4_i32 : i32
    %8 = arith.extui %7 : i1 to i32
    %c0_i32_2 = arith.constant 0 : i32
    %9 = arith.cmpi ne, %8, %c0_i32_2 : i32
    scf.if %9 {
      %c0 = arith.constant 0 : index
      %c0_5 = arith.constant 0 : index
      %13 = vector.load %arg2[%c0, %c0_5] : memref<8x128xf32, #tpu.memory_space<vmem>>, vector<8x128xf32>
      %c0_6 = arith.constant 0 : index
      %c0_7 = arith.constant 0 : index
      %14 = vector.load %arg3[%c0_6, %c0_7] : memref<8x128xf32, #tpu.memory_space<vmem>>, vector<8x128xf32>
      %15 = math.log %13 : vector<8x128xf32>
      %cst = arith.constant -1.000000e+02 : f32
      %16 = vector.broadcast %cst : f32 to vector<8x128xf32>
      %17 = arith.maximumf %15, %16 : vector<8x128xf32>
      %cst_8 = arith.constant 1.000000e+00 : f32
      %18 = vector.broadcast %cst_8 : f32 to vector<8x128xf32>
      %19 = arith.subf %18, %13 : vector<8x128xf32>
      %20 = math.log %19 : vector<8x128xf32>
      %cst_9 = arith.constant -1.000000e+02 : f32
      %21 = vector.broadcast %cst_9 : f32 to vector<8x128xf32>
      %22 = arith.maximumf %20, %21 : vector<8x128xf32>
      %23 = arith.mulf %14, %17 : vector<8x128xf32>
      %cst_10 = arith.constant 1.000000e+00 : f32
      %24 = vector.broadcast %cst_10 : f32 to vector<8x128xf32>
      %25 = arith.subf %24, %14 : vector<8x128xf32>
      %26 = arith.mulf %25, %22 : vector<8x128xf32>
      %27 = arith.addf %23, %26 : vector<8x128xf32>
      %cst_11 = arith.constant 0.000000e+00 : f32
      %28 = vector.broadcast %cst_11 : f32 to vector<8x128xf32>
      %29 = arith.subf %28, %27 : vector<8x128xf32>
      %c0_12 = arith.constant 0 : index
      %c0_13 = arith.constant 0 : index
      %c0_14 = arith.constant 0 : index
      %30 = vector.load %arg4[%c0_12, %c0_13, %c0_14] : memref<1x32x128xf32, #tpu.memory_space<vmem>>, vector<1x32x128xf32>
      %31 = vector.shape_cast %30 : vector<1x32x128xf32> to vector<32x128xf32>
      %32 = arith.mulf %13, %14 : vector<8x128xf32>
      %33 = vector.shape_cast %32 : vector<8x128xf32> to vector<1x8x128xf32>
      %cst_15 = arith.constant dense<0.000000e+00> : vector<8x128xf32>
      %34 = vector.multi_reduction <add>, %33, %cst_15 [0] : vector<1x8x128xf32> to vector<8x128xf32>
      %35 = vector.shape_cast %13 : vector<8x128xf32> to vector<1x8x128xf32>
      %cst_16 = arith.constant dense<0.000000e+00> : vector<8x128xf32>
      %36 = vector.multi_reduction <add>, %35, %cst_16 [0] : vector<1x8x128xf32> to vector<8x128xf32>
      %37 = vector.shape_cast %14 : vector<8x128xf32> to vector<1x8x128xf32>
      %cst_17 = arith.constant dense<0.000000e+00> : vector<8x128xf32>
      %38 = vector.multi_reduction <add>, %37, %cst_17 [0] : vector<1x8x128xf32> to vector<8x128xf32>
      %39 = vector.shape_cast %29 : vector<8x128xf32> to vector<1x8x128xf32>
      %cst_18 = arith.constant dense<0.000000e+00> : vector<8x128xf32>
      %40 = vector.multi_reduction <add>, %39, %cst_18 [0] : vector<1x8x128xf32> to vector<8x128xf32>
      %41 = tpu.concatenate %34, %36, %38, %40 in 0 : vector<8x128xf32>, vector<8x128xf32>, vector<8x128xf32>, vector<8x128xf32> -> vector<32x128xf32>
      %42 = arith.addf %31, %41 : vector<32x128xf32>
      %c0_19 = arith.constant 0 : index
      %c0_20 = arith.constant 0 : index
      %c0_21 = arith.constant 0 : index
      %43 = vector.load %arg4[%c0_19, %c0_20, %c0_21] : memref<1x32x128xf32, #tpu.memory_space<vmem>>, vector<1x32x128xf32>
      %44 = vector.shape_cast %43 : vector<1x32x128xf32> to vector<32x128xf32>
      %45 = vector.shape_cast %42 : vector<32x128xf32> to vector<1x32x128xf32>
      tpu.vector_store %arg4[%c0_19, %c0_20, %c0_21], %45 {strides = array<i32>} : memref<1x32x128xf32, #tpu.memory_space<vmem>>, vector<1x32x128xf32>,
    } else {
    }
    %c4_i32_3 = arith.constant 4 : i32
    %10 = arith.cmpi sgt, %6, %c4_i32_3 : i32
    %11 = arith.extui %10 : i1 to i32
    %c0_i32_4 = arith.constant 0 : i32
    %12 = arith.cmpi ne, %11, %c0_i32_4 : i32
    scf.if %12 {
      %c0 = arith.constant 0 : index
      %c0_5 = arith.constant 0 : index
      %13 = vector.load %arg2[%c0, %c0_5] : memref<8x128xf32, #tpu.memory_space<vmem>>, vector<8x128xf32>
      %c0_6 = arith.constant 0 : index
      %c0_7 = arith.constant 0 : index
      %14 = vector.load %arg3[%c0_6, %c0_7] : memref<8x128xf32, #tpu.memory_space<vmem>>, vector<8x128xf32>
      %c1_i32_8 = arith.constant 1 : i32
      %15 = arith.muli %arg0, %c1_i32_8 : i32
      %16 = arith.addi %15, %arg1 : i32
      %c8_i32_9 = arith.constant 8 : i32
      %17 = arith.muli %16, %c8_i32_9 : i32
      %18 = tpu.iota {dimensions = array<i32: 0>} : vector<8x128xi32>
      %19 = vector.broadcast %17 : i32 to vector<8x128xi32>
      %20 = arith.addi %18, %19 : vector<8x128xi32>
      %c4_i32_10 = arith.constant 4 : i32
      %21 = vector.broadcast %c4_i32_10 : i32 to vector<8x128xi32>
      %22 = arith.cmpi slt, %20, %21 : vector<8x128xi32>
      %cst = arith.constant 0.000000e+00 : f32
      %23 = vector.broadcast %cst : f32 to vector<8x128xf32>
      %24 = arith.select %22, %13, %23 : vector<8x128xi1>, vector<8x128xf32>
      %cst_11 = arith.constant 0.000000e+00 : f32
      %25 = vector.broadcast %cst_11 : f32 to vector<8x128xf32>
      %26 = arith.select %22, %14, %25 : vector<8x128xi1>, vector<8x128xf32>
      %27 = math.log %24 : vector<8x128xf32>
      %cst_12 = arith.constant -1.000000e+02 : f32
      %28 = vector.broadcast %cst_12 : f32 to vector<8x128xf32>
      %29 = arith.maximumf %27, %28 : vector<8x128xf32>
      %cst_13 = arith.constant 1.000000e+00 : f32
      %30 = vector.broadcast %cst_13 : f32 to vector<8x128xf32>
      %31 = arith.subf %30, %24 : vector<8x128xf32>
      %32 = math.log %31 : vector<8x128xf32>
      %cst_14 = arith.constant -1.000000e+02 : f32
      %33 = vector.broadcast %cst_14 : f32 to vector<8x128xf32>
      %34 = arith.maximumf %32, %33 : vector<8x128xf32>
      %35 = arith.mulf %26, %29 : vector<8x128xf32>
      %cst_15 = arith.constant 1.000000e+00 : f32
      %36 = vector.broadcast %cst_15 : f32 to vector<8x128xf32>
      %37 = arith.subf %36, %26 : vector<8x128xf32>
      %38 = arith.mulf %37, %34 : vector<8x128xf32>
      %39 = arith.addf %35, %38 : vector<8x128xf32>
      %cst_16 = arith.constant 0.000000e+00 : f32
      %40 = vector.broadcast %cst_16 : f32 to vector<8x128xf32>
      %41 = arith.subf %40, %39 : vector<8x128xf32>
      %c0_17 = arith.constant 0 : index
      %c0_18 = arith.constant 0 : index
      %c0_19 = arith.constant 0 : index
      %42 = vector.load %arg4[%c0_17, %c0_18, %c0_19] : memref<1x32x128xf32, #tpu.memory_space<vmem>>, vector<1x32x128xf32>
      %43 = vector.shape_cast %42 : vector<1x32x128xf32> to vector<32x128xf32>
      %44 = arith.mulf %24, %26 : vector<8x128xf32>
      %45 = vector.shape_cast %44 : vector<8x128xf32> to vector<1x8x128xf32>
      %cst_20 = arith.constant dense<0.000000e+00> : vector<8x128xf32>
      %46 = vector.multi_reduction <add>, %45, %cst_20 [0] : vector<1x8x128xf32> to vector<8x128xf32>
      %47 = vector.shape_cast %24 : vector<8x128xf32> to vector<1x8x128xf32>
      %cst_21 = arith.constant dense<0.000000e+00> : vector<8x128xf32>
      %48 = vector.multi_reduction <add>, %47, %cst_21 [0] : vector<1x8x128xf32> to vector<8x128xf32>
      %49 = vector.shape_cast %26 : vector<8x128xf32> to vector<1x8x128xf32>
      %cst_22 = arith.constant dense<0.000000e+00> : vector<8x128xf32>
      %50 = vector.multi_reduction <add>, %49, %cst_22 [0] : vector<1x8x128xf32> to vector<8x128xf32>
      %51 = vector.shape_cast %41 : vector<8x128xf32> to vector<1x8x128xf32>
      %cst_23 = arith.constant dense<0.000000e+00> : vector<8x128xf32>
      %52 = vector.multi_reduction <add>, %51, %cst_23 [0] : vector<1x8x128xf32> to vector<8x128xf32>
      %53 = tpu.concatenate %46, %48, %50, %52 in 0 : vector<8x128xf32>, vector<8x128xf32>, vector<8x128xf32>, vector<8x128xf32> -> vector<32x128xf32>
      %54 = arith.addf %43, %53 : vector<32x128xf32>
      %c0_24 = arith.constant 0 : index
      %c0_25 = arith.constant 0 : index
      %c0_26 = arith.constant 0 : index
      %55 = vector.load %arg4[%c0_24, %c0_25, %c0_26] : memref<1x32x128xf32, #tpu.memory_space<vmem>>, vector<1x32x128xf32>
      %56 = vector.shape_cast %55 : vector<1x32x128xf32> to vector<32x128xf32>
      %57 = vector.shape_cast %54 : vector<32x128xf32> to vector<1x32x128xf32>
      tpu.vector_store %arg4[%c0_24, %c0_25, %c0_26], %57 {strides = array<i32>} : memref<1x32x128xf32, #tpu.memory_space<vmem>>, vector<1x32x128xf32>,
    } else {
    }
    return
  }
  func.func @transform_0(%arg0: i32, %arg1: i32) -> (i32, i32) {
    %c1_i32 = arith.constant 1 : i32
    %0 = arith.muli %arg0, %c1_i32 : i32
    %1 = arith.addi %0, %arg1 : i32
    %c0_i32 = arith.constant 0 : i32
    %c0_i32_0 = arith.constant 0 : i32
    return %1, %c0_i32 : i32, i32
  }
  func.func @transform_1(%arg0: i32, %arg1: i32) -> (i32, i32) {
    %c1_i32 = arith.constant 1 : i32
    %0 = arith.muli %arg0, %c1_i32 : i32
    %1 = arith.addi %0, %arg1 : i32
    %c0_i32 = arith.constant 0 : i32
    %c0_i32_0 = arith.constant 0 : i32
    return %1, %c0_i32 : i32, i32
  }
  func.func @transform_2(%arg0: i32, %arg1: i32) -> (i32, i32, i32) {
    %c0_i32 = arith.constant 0 : i32
    %c0_i32_0 = arith.constant 0 : i32
    %c0_i32_1 = arith.constant 0 : i32
    return %arg0, %c0_i32, %c0_i32_0 : i32, i32, i32
  }
}

</mosaic_0001>

<bundles_post_ra>
// kernel: dice_bce_loss.1
= control target key start
LH: loop header
LB: loop body
LE: loop exit
PB: predicated region body
PF: predicated region fallthrough
CT: control target
= control target key end

     0   :  { %v128_v0 = vlaneseq  ;;  %s218_s0 = inlined_call_operand.vmem [shape: f32[4,128], index: 0, kind: input, shape index: {}]   ;;  %s219_s1 = inlined_call_operand.vmem [shape: f32[4,128], index: 1, kind: input, shape index: {}]   ;;  %s220_s2 = inlined_call_operand.vmem [shape: f32[1,32,128], index: 2, kind: output, shape index: {}]  }
   0x1   :  { %v125_v1 = vld [vmem:[%s218_s0] sm:$0xff] }
   0x2   :  { %v126_v2 = vld [vmem:[%s219_s1] sm:$0xff]  ;;  %v129_v3 = vshrl.u32 %v128_v0, 7 }
   0x4   :  { %vm132_vm0 = vcmp.lt.s32.totalorder %v129_v3, 4 }
   0x5   :  { %v133_v4 = vsel %vm132_vm0, %v125_v1, 0.0  ;;  %v134_v5 = vsel %vm132_vm0, %v126_v2, 0.0 }
   0x6   :  { %v138_v6 = vsub.f32 1.0, %v133_v4  ;;  %v151_v7 = vmul.f32 %v134_v5, %v133_v4  ;;  %181 = vlog2.f32 %v133_v4  ;;  %161 = vst [vmem:[%s220_s2 + $0x8] sm:$0xff] %v133_v4  ;;  %162 = vst [vmem:[%s220_s2 + $0x10] sm:$0xff] %v134_v5  ;;  %v143_v12 = vsub.f32 1.0, %v134_v5 }
   0x8   :  { %183 = vlog2.f32 %v138_v6  ;;  %160 = vst [vmem:[%s220_s2] sm:$0xff] %v151_v7 }
  0x10   :  { %v182_v8 = vpop.eup %181 }
  0x11   :  { %v136_v10 = vmul.f32 0.6931472, %v182_v8 }
  0x12   :  { %v184_v9 = vpop.eup %183 }
  0x13   :  { %v140_v11 = vmul.f32 0.6931472, %v184_v9  ;;  %v137_v13 = vmax.f32 %v136_v10, -100.0 }
  0x15   :  { %v141_v14 = vmax.f32 %v140_v11, -100.0  ;;  %v142_v15 = vmul.f32 %v137_v13, %v134_v5 }
  0x17   :  { %v144_v16 = vmul.f32 %v143_v12, %v141_v14 }
  0x19   :  { %v145_v17 = vadd.f32 %v144_v16, %v142_v15 }
  0x1b   :  { %v146_v18 = vsub.f32 0.0, %v145_v17 }
  0x1d   :  { %163 = vst [vmem:[%s220_s2 + $0x18] sm:$0xff] %v146_v18 }

</bundles_post_ra>
